<compile_context>
chip_gen: v7x
topology: tpu7x:2x2x1
jax: 0.10.0
libtpu: 0.0.40
codegen_flags: <defaults>
</compile_context>

<pallas_src>
import jax
import jax.numpy as jnp
from jax import lax
from jax.experimental import pallas as pl
from jax.experimental.pallas import tpu as pltpu  # noqa: F401  (TPU backend)

BN_EPS = 1e-5      # torch.nn.BatchNorm1d default eps
L2_EPS = 1e-12     # F.normalize default eps

HIDDEN = 30        # gnn1 hidden_channels
LIN_OUT = 30       # lin1: Linear(30, 30)

# Packed-parameter layout (rows of a (PARAM_ROWS, 30) f32 array).
ROW_W1 = 0         # DenseSAGEConv weight, (1, 30)
ROW_B1 = 1         # DenseSAGEConv bias,   (1, 30)
ROW_LINB = 2       # lin1 bias,            (1, 30)
ROW_LINW = 8       # lin1 weight^T (in, out), rows 8:38  (sublane-aligned)
PARAM_ROWS = 40


def net0_kernel(x_ref, adj_ref, params_ref, out_ref):
    # x_ref:      (B, 1, N)  node features, lane-major (in_channels == 1)
    # adj_ref:    (B, N, N)
    # params_ref: (PARAM_ROWS, 30)  packed small parameters (single DMA)
    # out_ref:    (B, 30)
    x_b = x_ref[...]
    adj = adj_ref[...]
    B = adj.shape[0]
    N = adj.shape[1]

    w1 = params_ref[ROW_W1:ROW_W1 + 1, :]                 # (1, 30)
    b1 = params_ref[ROW_B1:ROW_B1 + 1, :]                 # (1, 30)
    lin_b = params_ref[ROW_LINB:ROW_LINB + 1, :]          # (1, 30)
    lin_w_t = params_ref[ROW_LINW:ROW_LINW + LIN_OUT, :]  # (30, 30) = W.T (in, out)

    # ---- DenseSAGEConv(1 -> 30, normalize=True), add_loop=True -------------
    # add_loop: set diagonal of adj to 1
    row = lax.broadcasted_iota(jnp.int32, (N, N), 0)
    col = lax.broadcasted_iota(jnp.int32, (N, N), 1)
    adj_l = jnp.where((row == col)[None, :, :], jnp.float32(1.0), adj)   # (B, N, N)

    # Aggregation on the VPU (no MXU): x is lane-major, so adj_l * x_b is a
    # pure broadcast-multiply.  The degree is fused into the same lane
    # reduction by concatenating [adj_l * x, adj_l] along the untiled leading
    # axis -> one cross-lane reduction pass over both.
    prod = adj_l * x_b                                     # (B, N, N)
    both = jnp.concatenate([prod, adj_l], axis=0)          # (2B, N, N)
    red = jnp.sum(both, axis=-1, keepdims=True)            # (2B, N, 1)
    agg = red[:B]                                          # (B, N, 1)  adj_l @ x
    deg = red[B:]                                          # (B, N, 1)  row degree
    agg = agg / jnp.maximum(deg, 1.0)                      # deg.clamp(min=1)

    # Linear transform: in_channels == 1 -> broadcast multiply, no matmul.
    h = agg * w1 + b1                                      # (B, N, 30)

    # F.normalize(p=2, dim=-1):  h / max(||h||, eps) == h * rsqrt(max(||h||^2, eps^2))
    sumsq = jnp.sum(h * h, axis=-1, keepdims=True)
    h = h * lax.rsqrt(jnp.maximum(sumsq, jnp.float32(L2_EPS * L2_EPS)))

    # ---- BatchNorm1d(30): training-mode batch stats over (B*N), gamma=1,
    # beta=0 (fresh module defaults). Single pass: E[h], E[h^2]. -------------
    inv_cnt = jnp.float32(1.0 / (B * N))
    mu = jnp.sum(h, axis=(0, 1), keepdims=True) * inv_cnt
    m2 = jnp.sum(h * h, axis=(0, 1), keepdims=True) * inv_cnt
    var = m2 - mu * mu                                     # biased variance
    h = (h - mu) * lax.rsqrt(var + BN_EPS)

    # ReLU
    h = jnp.maximum(h, 0.0)

    # TODO(synk): the reference GNN.forward then re-applies conv1 (weight (1,30))
    # to a 30-channel input, and Net0.forward calls self.bn1() with no
    # arguments; both raise in PyTorch, so they are omitted here.

    # ---- x.mean(dim=1) ------------------------------------------------------
    pooled = jnp.mean(h, axis=1)                           # (B, 30)

    # ---- relu(lin1(x)) ------------------------------------------------------
    # Left as a single tiny MXU dot ("leave it alone" per review); a VPU
    # rewrite would require a sublane<->lane relayout of `pooled`.
    out = jnp.dot(pooled, lin_w_t,
                  preferred_element_type=jnp.float32) + lin_b
    out_ref[...] = jnp.maximum(out, 0.0)                   # (B, 30)


@jax.jit
def net0_forward(x, adj, w1, b1, lin_w, lin_b):
    """x: (B, N, 1); adj: (B, N, N); w1/b1: (1, 30);
    lin_w: torch layout (out, in) = (30, 30); lin_b: (1, 30)."""
    B, N, _ = x.shape

    # Lane-major features: (B, N, 1) -> (B, 1, N) so the aggregation is a
    # broadcast-multiply against adj with no in-kernel relayout.
    x_l = x.reshape(B, 1, N)

    # Pack all small parameters into one (40, 30) array -> single input DMA.
    params = jnp.zeros((PARAM_ROWS, HIDDEN), jnp.float32)
    params = params.at[ROW_W1, :].set(w1.reshape(-1))
    params = params.at[ROW_B1, :].set(b1.reshape(-1))
    params = params.at[ROW_LINB, :].set(lin_b.reshape(-1))
    params = params.at[ROW_LINW:ROW_LINW + LIN_OUT, :].set(lin_w.T)  # (in, out)

    # Tiny single-shot kernel: no grid, all operands resident in VMEM.
    return pl.pallas_call(
        net0_kernel,
        out_shape=jax.ShapeDtypeStruct((B, LIN_OUT), jnp.float32),
    )(x_l, adj, params)


def reference(x, adj, w1, b1, lin_w, lin_b):
    """Pure-JAX reference for correctness checking (PyTorch semantics)."""
    B, N, _ = x.shape
    eye = jnp.eye(N, dtype=bool)
    adj_l = jnp.where(eye[None], 1.0, adj)
    agg = jnp.einsum('bij,bjc->bic', adj_l, x)
    agg = agg / jnp.maximum(jnp.sum(adj_l, -1, keepdims=True), 1.0)
    h = agg * w1 + b1
    h = h / jnp.maximum(jnp.linalg.norm(h, axis=-1, keepdims=True), L2_EPS)
    mu = jnp.mean(h, axis=(0, 1), keepdims=True)
    var = jnp.mean((h - mu) ** 2, axis=(0, 1), keepdims=True)
    h = jnp.maximum((h - mu) / jnp.sqrt(var + BN_EPS), 0.0)
    pooled = jnp.mean(h, axis=1)
    return jnp.maximum(pooled @ lin_w.T + lin_b, 0.0)


if __name__ == "__main__":
    key = jax.random.PRNGKey(0)
    kx, ka, kw1, kb1, klw, klb = jax.random.split(key, 6)

    B, N, C = 2, 16, 1   # small shapes consistent with the module's forward

    x = jax.random.normal(kx, (B, N, C), dtype=jnp.float32)
    adj = jax.random.bernoulli(ka, 0.3, (B, N, N)).astype(jnp.float32)

    # Deterministic parameter init (shapes from the module's __init__).
    w1 = jax.random.normal(kw1, (1, HIDDEN), dtype=jnp.float32) * 0.5     # DenseSAGEConv weight (in=1, out=30)
    b1 = jax.random.normal(kb1, (1, HIDDEN), dtype=jnp.float32) * 0.1     # DenseSAGEConv bias
    lin_w = jax.random.normal(klw, (LIN_OUT, HIDDEN), dtype=jnp.float32) * 0.2  # torch Linear weight (out, in)
    lin_b = jax.random.normal(klb, (1, LIN_OUT), dtype=jnp.float32) * 0.1

    out = net0_forward(x, adj, w1, b1, lin_w, lin_b)
    out = jax.block_until_ready(out)

    ref = reference(x, adj, w1, b1, lin_w, lin_b)
    assert out.shape == (B, LIN_OUT)
    assert jnp.allclose(out, ref, atol=1e-4, rtol=1e-4), "mismatch vs reference"

    print("KERNEL_OK")
</pallas_src>

<mosaic_0001>
module attributes {stable_mosaic.version = 11 : i64} {
  func.func @net0_kernel(%arg0: memref<2x1x16xf32, #tpu.memory_space<vmem>>, %arg1: memref<2x16x16xf32, #tpu.memory_space<vmem>>, %arg2: memref<40x30xf32, #tpu.memory_space<vmem>>, %arg3: memref<2x30xf32, #tpu.memory_space<vmem>>) attributes {dimension_semantics = [], scalar_prefetch = 0 : i64, scratch_operands = 0 : i64, tpu.core_type = #tpu.core_type<tc>} {
    %c0 = arith.constant 0 : index
    %c0_0 = arith.constant 0 : index
    %c0_1 = arith.constant 0 : index
    %0 = vector.load %arg0[%c0, %c0_0, %c0_1] : memref<2x1x16xf32, #tpu.memory_space<vmem>>, vector<2x1x16xf32>
    %c0_2 = arith.constant 0 : index
    %c0_3 = arith.constant 0 : index
    %c0_4 = arith.constant 0 : index
    %1 = vector.load %arg1[%c0_2, %c0_3, %c0_4] : memref<2x16x16xf32, #tpu.memory_space<vmem>>, vector<2x16x16xf32>
    %c0_5 = arith.constant 0 : index
    %c0_6 = arith.constant 0 : index
    %2 = vector.load %arg2[%c0_5, %c0_6] : memref<40x30xf32, #tpu.memory_space<vmem>>, vector<1x30xf32>
    %c1 = arith.constant 1 : index
    %c0_7 = arith.constant 0 : index
    %3 = vector.load %arg2[%c1, %c0_7] : memref<40x30xf32, #tpu.memory_space<vmem>>, vector<1x30xf32>
    %c2 = arith.constant 2 : index
    %c0_8 = arith.constant 0 : index
    %4 = vector.load %arg2[%c2, %c0_8] : memref<40x30xf32, #tpu.memory_space<vmem>>, vector<1x30xf32>
    %c8 = arith.constant 8 : index
    %c0_9 = arith.constant 0 : index
    %5 = vector.load %arg2[%c8, %c0_9] : memref<40x30xf32, #tpu.memory_space<vmem>>, vector<30x30xf32>
    %6 = tpu.iota {dimensions = array<i32: 0>} : vector<16x16xi32>
    %7 = tpu.iota {dimensions = array<i32: 1>} : vector<16x16xi32>
    %8 = arith.cmpi eq, %6, %7 : vector<16x16xi32>
    %9 = vector.shape_cast %8 : vector<16x16xi1> to vector<1x16x16xi1>
    %cst = arith.constant 1.000000e+00 : f32
    %10 = vector.shape_cast %9 : vector<1x16x16xi1> to vector<1x16x16xi1>
    %11 = vector.broadcast %10 : vector<1x16x16xi1> to vector<2x16x16xi1>
    %12 = vector.broadcast %cst : f32 to vector<2x16x16xf32>
    %13 = arith.select %11, %12, %1 : vector<2x16x16xi1>, vector<2x16x16xf32>
    %14 = vector.broadcast %0 : vector<2x1x16xf32> to vector<2x16x16xf32>
    %15 = arith.mulf %13, %14 : vector<2x16x16xf32>
    %16 = tpu.concatenate %15, %13 in 0 : vector<2x16x16xf32>, vector<2x16x16xf32> -> vector<4x16x16xf32>
    %cst_10 = arith.constant dense<0.000000e+00> : vector<4x16xf32>
    %17 = vector.multi_reduction <add>, %16, %cst_10 [2] : vector<4x16x16xf32> to vector<4x16xf32>
    %18 = vector.shape_cast %17 : vector<4x16xf32> to vector<4x16x1xf32>
    %19 = vector.extract_strided_slice %18 {offsets = [0, 0, 0], sizes = [2, 16, 1], strides = [1, 1, 1]} : vector<4x16x1xf32> to vector<2x16x1xf32>
    %20 = vector.extract_strided_slice %18 {offsets = [2, 0, 0], sizes = [2, 16, 1], strides = [1, 1, 1]} : vector<4x16x1xf32> to vector<2x16x1xf32>
    %cst_11 = arith.constant 1.000000e+00 : f32
    %21 = vector.broadcast %cst_11 : f32 to vector<2x16x1xf32>
    %22 = arith.maximumf %20, %21 : vector<2x16x1xf32>
    %23 = arith.divf %19, %22 : vector<2x16x1xf32>
    %24 = vector.shape_cast %2 : vector<1x30xf32> to vector<1x1x30xf32>
    %25 = vector.broadcast %23 : vector<2x16x1xf32> to vector<2x16x30xf32>
    %26 = vector.broadcast %24 : vector<1x1x30xf32> to vector<2x16x30xf32>
    %27 = arith.mulf %25, %26 : vector<2x16x30xf32>
    %28 = vector.shape_cast %3 : vector<1x30xf32> to vector<1x1x30xf32>
    %29 = vector.broadcast %28 : vector<1x1x30xf32> to vector<2x16x30xf32>
    %30 = arith.addf %27, %29 : vector<2x16x30xf32>
    %31 = arith.mulf %30, %30 : vector<2x16x30xf32>
    %cst_12 = arith.constant dense<0.000000e+00> : vector<2x16xf32>
    %32 = vector.multi_reduction <add>, %31, %cst_12 [2] : vector<2x16x30xf32> to vector<2x16xf32>
    %33 = vector.shape_cast %32 : vector<2x16xf32> to vector<2x16x1xf32>
    %cst_13 = arith.constant 1.000000e-24 : f32
    %34 = vector.broadcast %cst_13 : f32 to vector<2x16x1xf32>
    %35 = arith.maximumf %33, %34 : vector<2x16x1xf32>
    %36 = math.rsqrt %35 : vector<2x16x1xf32>
    %37 = vector.broadcast %36 : vector<2x16x1xf32> to vector<2x16x30xf32>
    %38 = arith.mulf %30, %37 : vector<2x16x30xf32>
    %cst_14 = arith.constant dense<0.000000e+00> : vector<30xf32>
    %39 = vector.multi_reduction <add>, %38, %cst_14 [0, 1] : vector<2x16x30xf32> to vector<30xf32>
    %40 = vector.shape_cast %39 : vector<30xf32> to vector<1x1x30xf32>
    %cst_15 = arith.constant 3.125000e-02 : f32
    %41 = vector.broadcast %cst_15 : f32 to vector<1x1x30xf32>
    %42 = arith.mulf %40, %41 : vector<1x1x30xf32>
    %43 = arith.mulf %38, %38 : vector<2x16x30xf32>
    %cst_16 = arith.constant dense<0.000000e+00> : vector<30xf32>
    %44 = vector.multi_reduction <add>, %43, %cst_16 [0, 1] : vector<2x16x30xf32> to vector<30xf32>
    %45 = vector.shape_cast %44 : vector<30xf32> to vector<1x1x30xf32>
    %cst_17 = arith.constant 3.125000e-02 : f32
    %46 = vector.broadcast %cst_17 : f32 to vector<1x1x30xf32>
    %47 = arith.mulf %45, %46 : vector<1x1x30xf32>
    %48 = arith.mulf %42, %42 : vector<1x1x30xf32>
    %49 = arith.subf %47, %48 : vector<1x1x30xf32>
    %50 = vector.broadcast %42 : vector<1x1x30xf32> to vector<2x16x30xf32>
    %51 = arith.subf %38, %50 : vector<2x16x30xf32>
    %cst_18 = arith.constant 9.99999974E-6 : f32
    %52 = vector.broadcast %cst_18 : f32 to vector<1x1x30xf32>
    %53 = arith.addf %49, %52 : vector<1x1x30xf32>
    %54 = math.rsqrt %53 : vector<1x1x30xf32>
    %55 = vector.broadcast %54 : vector<1x1x30xf32> to vector<2x16x30xf32>
    %56 = arith.mulf %51, %55 : vector<2x16x30xf32>
    %cst_19 = arith.constant 0.000000e+00 : f32
    %57 = vector.broadcast %cst_19 : f32 to vector<2x16x30xf32>
    %58 = arith.maximumf %56, %57 : vector<2x16x30xf32>
    %cst_20 = arith.constant dense<0.000000e+00> : vector<2x30xf32>
    %59 = vector.multi_reduction <add>, %58, %cst_20 [1] : vector<2x16x30xf32> to vector<2x30xf32>
    %cst_21 = arith.constant 1.600000e+01 : f32
    %60 = vector.broadcast %cst_21 : f32 to vector<2x30xf32>
    %61 = arith.divf %59, %60 : vector<2x30xf32>
    %cst_22 = arith.constant dense<0.000000e+00> : vector<2x30xf32>
    %62 = tpu.matmul %61, %5, %cst_22 {dimension_numbers = #tpu.dot_dimension_numbers<[1], [0], [0], [1], [0, 0, 1, 1], [], []>} : vector<2x30xf32>, vector<30x30xf32>, vector<2x30xf32> -> vector<2x30xf32>
    %63 = vector.broadcast %4 : vector<1x30xf32> to vector<2x30xf32>
    %64 = arith.addf %62, %63 : vector<2x30xf32>
    %cst_23 = arith.constant 0.000000e+00 : f32
    %65 = vector.broadcast %cst_23 : f32 to vector<2x30xf32>
    %66 = arith.maximumf %64, %65 : vector<2x30xf32>
    %c0_24 = arith.constant 0 : index
    %c0_25 = arith.constant 0 : index
    %67 = vector.load %arg3[%c0_24, %c0_25] : memref<2x30xf32, #tpu.memory_space<vmem>>, vector<2x30xf32>
    tpu.vector_store %arg3[%c0_24, %c0_25], %66 {strides = array<i32>} : memref<2x30xf32, #tpu.memory_space<vmem>>, vector<2x30xf32>,
    return
  }
}

</mosaic_0001>

<bundles_post_ra>
// kernel: net0_forward.1
= control target key start
LH: loop header
LB: loop body
LE: loop exit
PB: predicated region body
PF: predicated region fallthrough
CT: control target
= control target key end

     0   :  { %v28_v0 = vlaneseq  ;;  %s489_s0 = inlined_call_operand.vmem [shape: f32[2,1,16], index: 0, kind: input, shape index: {}]   ;;  %s490_s1 = inlined_call_operand.vmem [shape: f32[2,16,16], index: 1, kind: input, shape index: {}]   ;;  %s491_s2 = inlined_call_operand.vmem [shape: f32[40,30], index: 2, kind: input, shape index: {}]   ;;  %s492_s3 = inlined_call_operand.hbm [shape: f32[2,30], index: 3, kind: output, shape index: {}]  }
   0x1   :  { %v17_v1 = vld [vmem:[%s490_s1] sm:$0xff]  ;;  %v19_v4 = vld [vmem:[%s490_s1 + $0x10] sm:$0xff] }
   0x2   :  { %v29_v2 = vshrl.u32 %v28_v0, 7  ;;  %v32_v3 = vand.u32 127, %v28_v0 }
   0x3   :  { %8 = vsyncpa [#allocation3], 0  ;;  %vm59_vm0 = vcmask 130048   ;;  %v311_v7 = vld [vmem:[%s489_s0] ss:$0 sm:$0xff]  ;;  %v18_v9 = vld [vmem:[%s490_s1 + $0x8] sm:$0xff] }
   0x4   :  { %vm33_vm1 = vcmp.eq.s32.totalorder %v29_v2, %v32_v3  ;;  %v30_v5 = vadd.s32 8, %v29_v2  ;;  %v20_v10 = vld [vmem:[%s490_s1 + $0x18] sm:$0xff]  ;;  %v312_v16 = vld [vmem:[%s489_s0 + $0x1] ss:$0 sm:$0xff]  ;;  %v313_v38 = vld [vmem:[%s491_s2] ss:$0 sm:$0xff] }
   0x5   :  { %v39_v6 = vsel %vm33_vm1, 1.0, %v17_v1  ;;  %v41_v8 = vsel %vm33_vm1, 1.0, %v19_v4  ;;  %v314_v42 = vld [vmem:[%s491_s2 + $0x1] ss:$0 sm:$0xff]  ;;  %vm116_vm3 = vcmask 244736   ;;  %v24_v0 = vld [vmem:[%s491_s2 + $0x8] sm:$0xff] }
   0x6   :  { %v72_v11 = vsel %vm59_vm0, %v39_v6, 0.0  ;;  %v78_v12 = vsel %vm59_vm0, %v41_v8, 0.0  ;;  %vm34_vm2 = vcmp.eq.s32.totalorder %v30_v5, %v32_v3  ;;  %v55_v13 = vmul.f32 %v311_v7, %v39_v6  ;;  %v25_v1 = vld [vmem:[%s491_s2 + $0x10] sm:$0xff]  ;;  %v26_v2 = vld [vmem:[%s491_s2 + $0x18] sm:$0xff]  ;;  %v27_v5 = vld [vmem:[%s491_s2 + $0x20] sm:$0x3f] }
   0x7   :  { %73 = vadd.xlane.f32.xlu0 %v72_v11  ;;  %79 = vadd.xlane.f32.xlu1 %v78_v12  ;;  %v40_v14 = vsel %vm34_vm2, 1.0, %v18_v9  ;;  %v42_v15 = vsel %vm34_vm2, 1.0, %v20_v10  ;;  %v57_v20 = vmul.f32 %v312_v16, %v41_v8  ;;  %vm220_vm4 = vcmask 1045504   ;;  %s392_s9 = smov [#allocation2]  }
   0x8   :  { %v75_v17 = vsel %vm59_vm0, %v40_v14, 0.0  ;;  %v81_v18 = vsel %vm59_vm0, %v42_v15, 0.0  ;;  %v56_v19 = vmul.f32 %v311_v7, %v40_v14  ;;  %v60_v21 = vsel %vm59_vm0, %v55_v13, 0.0  ;;  %s303_s10 = sshll.u32 %s392_s9, 4  ;;  %s304_s10 = int_to_ptr.vmem [resolvable:$true] %s303_s10 }
   0x9   :  { %v58_v23 = vmul.f32 %v312_v16, %v42_v15  ;;  %v66_v24 = vsel %vm59_vm0, %v57_v20, 0.0  ;;  %v388_v3 = vmov 0.0|0.0   ;;  %v335_v4 = vpack.c.bf16 %v25_v1, %v24_v0  ;;  %s364_s11 = scalar_lea.vmem %s304_s10, 32  ;;  %p369_p1 = scmp.lt.s32.totalorder %s304_s10, %s304_s10 }
   0xa   :  { %v63_v22 = vsel %vm59_vm0, %v56_v19, 0.0  ;;  %334 = vmatprep.subr.bf16.mxu0 %v388_v3  ;;  %vm389_vm5 = vmmov 0   ;;  %v390_v6 = vmov 0.0   ;;  %v338_v7 = vpack.c.bf16 %v27_v5, %v26_v2  ;;  %p365_p0 = scmp.ne.s32.totalorder %s304_s10, %s364_s11  ;;  %p370_p2 = scmp.lt.s32.totalorder %s364_s11, %s364_s11 }
   0xb   :  { %76 = vadd.xlane.f32.xlu0 %v75_v17  ;;  %82 = vadd.xlane.f32.xlu1 %v81_v18  ;;  %v69_v25 = vsel %vm59_vm0, %v58_v23, 0.0  ;;  %vm391_vm6 = vmmov 1   ;;  %vm216_vm8 = vcmask 1041409   ;;  %vm295_vm9 = vcmask 238592  }
   0xc   :  { %331 = vmatprep.mubr.msk.f32.mxu0 %vm389_vm5, %v390_v6  ;;  %336 = vmatpush3.bf16.msra.mxu0 %v335_v4  ;;  %vm339_vm7 = vmpackc.low %vm220_vm4, %vm391_vm6  ;;  %p371_p3 = por %p370_p2, %p369_p1 }
   0xd   :  { %337 = vmatprep.subr.bf16.mxu0 %v388_v3 }
   0xe   :  { %p372_p4 = pnand %p371_p3, %p365_p0 }
   0xf   :  { %61 = vadd.xlane.f32.xlu0 %v60_v21  ;;  %64 = vadd.xlane.f32.xlu1 %v63_v22 }
  0x10   :  { %340 = vmatpush3.bf16.msk.msra.mxu0 %vm339_vm7, %v338_v7 }
  0x13   :  { %67 = vadd.xlane.f32.xlu0 %v66_v24  ;;  %70 = vadd.xlane.f32.xlu1 %v69_v25 }
  0x94   :  { %v74_v26 = vpop.xlane.xlu0 %73  ;;  %v80_v27 = vpop.xlane.xlu1 %79 }
  0x95   :  { %v84_v28 = vmax.f32 %v74_v26, 1.0  ;;  %v86_v29 = vmax.f32 %v80_v27, 1.0 }
  0x97   :  { %346 = vrcp.f32 %v84_v28 }
  0x98   :  { %348 = vrcp.f32 %v86_v29  ;;  %v77_v30 = vpop.xlane.xlu0 %76  ;;  %v83_v31 = vpop.xlane.xlu1 %82 }
  0x99   :  { %v85_v32 = vmax.f32 %v77_v30, 1.0  ;;  %v87_v33 = vmax.f32 %v83_v31, 1.0 }
  0x9b   :  { %350 = vrcp.f32 %v85_v32 }
  0x9c   :  { %352 = vrcp.f32 %v87_v33  ;;  %v62_v34 = vpop.xlane.xlu0 %61  ;;  %v65_v35 = vpop.xlane.xlu1 %64 }
  0xa0   :  { %v68_v36 = vpop.xlane.xlu0 %67  ;;  %v71_v44 = vpop.xlane.xlu1 %70 }
  0xa1   :  { %v347_v37 = vpop.eup %346 }
  0xa2   :  { %v349_v39 = vpop.eup %348  ;;  %v89_v40 = vmul.f32 %v347_v37, %v62_v34 }
  0xa3   :  { %v93_v41 = vmul.f32 %v349_v39, %v68_v36 }
  0xa4   :  { %v100_v43 = vmul.f32 %v313_v38, %v89_v40 }
  0xa5   :  { %v351_v45 = vpop.eup %350  ;;  %v102_v46 = vmul.f32 %v313_v38, %v93_v41 }
  0xa6   :  { %v353_v47 = vpop.eup %352  ;;  %v91_v48 = vmul.f32 %v351_v45, %v65_v35  ;;  %v108_v49 = vadd.f32 %v314_v42, %v100_v43 }
  0xa7   :  { %v95_v50 = vmul.f32 %v353_v47, %v71_v44  ;;  %v110_v51 = vadd.f32 %v314_v42, %v102_v46 }
  0xa8   :  { %v101_v52 = vmul.f32 %v313_v38, %v91_v48  ;;  %v112_v53 = vmul.f32 %v108_v49, %v108_v49 }
  0xa9   :  { %v103_v54 = vmul.f32 %v313_v38, %v95_v50  ;;  %v114_v55 = vmul.f32 %v110_v51, %v110_v51 }
  0xaa   :  { %v117_v56 = vsel %vm116_vm3, %v112_v53, 0.0  ;;  %v109_v57 = vadd.f32 %v314_v42, %v101_v52 }
  0xab   :  { %118 = vadd.xlane.f32.xlu0 %v117_v56  ;;  %v111_v58 = vadd.f32 %v314_v42, %v103_v54  ;;  %v123_v60 = vsel %vm116_vm3, %v114_v55, 0.0 }
  0xac   :  { %v113_v59 = vmul.f32 %v109_v57, %v109_v57 }
  0xad   :  { %v115_v61 = vmul.f32 %v111_v58, %v111_v58 }
  0xae   :  { %v120_v62 = vsel %vm116_vm3, %v113_v59, 0.0 }
  0xaf   :  { %121 = vadd.xlane.f32.xlu1 %v120_v62  ;;  %124 = vadd.xlane.f32.xlu0 %v123_v60  ;;  %v126_v63 = vsel %vm116_vm3, %v115_v61, 0.0 }
  0xb3   :  { %127 = vadd.xlane.f32.xlu1 %v126_v63 }
 0x138   :  { %v119_v8 = vpop.xlane.xlu0 %118 }
 0x139   :  { %v129_v9 = vmax.f32 %v119_v8, 1e-24 }
 0x13b   :  { %354 = vrsqrt.f32 %v129_v9 }
 0x13c   :  { %v122_v10 = vpop.xlane.xlu1 %121  ;;  %v125_v11 = vpop.xlane.xlu0 %124 }
 0x13d   :  { %v130_v12 = vmax.f32 %v122_v10, 1e-24  ;;  %v131_v13 = vmax.f32 %v125_v11, 1e-24 }
 0x13f   :  { %356 = vrsqrt.f32 %v130_v12 }
 0x140   :  { %358 = vrsqrt.f32 %v131_v13  ;;  %v128_v14 = vpop.xlane.xlu1 %127 }
 0x141   :  { %v132_v15 = vmax.f32 %v128_v14, 1e-24 }
 0x143   :  { %360 = vrsqrt.f32 %v132_v15 }
 0x145   :  { %v355_v16 = vpop.eup %354 }
 0x146   :  { %v137_v17 = vmul.f32 %v355_v16, %v108_v49 }
 0x148   :  { %v155_v20 = vmul.f32 %v137_v17, %v137_v17  ;;  %v141_v23 = vsel %vm116_vm3, %v137_v17, 0.0 }
 0x149   :  { %v357_v18 = vpop.eup %356 }
 0x14a   :  { %v359_v19 = vpop.eup %358  ;;  %v138_v21 = vmul.f32 %v357_v18, %v109_v57  ;;  %v159_v29 = vsel %vm116_vm3, %v155_v20, 0.0 }
 0x14b   :  { %v139_v22 = vmul.f32 %v359_v19, %v110_v51 }
 0x14c   :  { %v142_v24 = vsel %vm116_vm3, %v138_v21, 0.0  ;;  %v156_v25 = vmul.f32 %v138_v21, %v138_v21 }
 0x14d   :  { %v361_v26 = vpop.eup %360  ;;  %v143_v27 = vadd.f32 %v142_v24, %v141_v23  ;;  %v157_v28 = vmul.f32 %v139_v22, %v139_v22  ;;  %v144_v31 = vsel %vm116_vm3, %v139_v22, 0.0 }
 0x14e   :  { %v160_v30 = vsel %vm116_vm3, %v156_v25, 0.0  ;;  %v140_v32 = vmul.f32 %v361_v26, %v111_v58 }
 0x14f   :  { %v161_v33 = vadd.f32 %v160_v30, %v159_v29  ;;  %v145_v34 = vadd.f32 %v144_v31, %v143_v27  ;;  %v162_v35 = vsel %vm116_vm3, %v157_v28, 0.0  ;;  %v315_v29 = vld [vmem:[%s491_s2 + $0x2] ss:$0 sm:$0xff] }
 0x150   :  { %v146_v36 = vsel %vm116_vm3, %v140_v32, 0.0  ;;  %v158_v37 = vmul.f32 %v140_v32, %v140_v32 }
 0x151   :  { %v163_v38 = vadd.f32 %v162_v35, %v161_v33  ;;  %v147_v39 = vadd.f32 %v146_v36, %v145_v34 }
 0x152   :  { %v164_v40 = vsel %vm116_vm3, %v158_v37, 0.0 }
 0x153   :  { %v148_v41 = vrot.slane %v147_v39, 4  ;;  %v165_v42 = vadd.f32 %v164_v40, %v163_v38 }
 0x155   :  { %v149_v43 = vadd.f32 %v148_v41, %v147_v39  ;;  %v166_v44 = vrot.slane %v165_v42, 4 }
 0x157   :  { %v150_v45 = vrot.slane %v149_v43, 2  ;;  %v167_v46 = vadd.f32 %v166_v44, %v165_v42 }
 0x159   :  { %v151_v47 = vadd.f32 %v150_v45, %v149_v43  ;;  %v168_v48 = vrot.slane %v167_v46, 2 }
 0x15b   :  { %v152_v49 = vrot.slane %v151_v47, 1  ;;  %v169_v50 = vadd.f32 %v168_v48, %v167_v46 }
 0x15d   :  { %v153_v51 = vadd.f32 %v152_v49, %v151_v47  ;;  %v170_v52 = vrot.slane %v169_v50, 1 }
 0x15f   :  { %v154_v53 = vmul.f32 0.03125, %v153_v51  ;;  %v171_v54 = vadd.f32 %v170_v52, %v169_v50 }
 0x161   :  { %v172_v55 = vmul.f32 0.03125, %v171_v54  ;;  %v173_v56 = vmul.f32 %v154_v53, %v154_v53  ;;  %v178_v59 = vsub.f32 %v140_v32, %v154_v53  ;;  %v175_v60 = vsub.f32 %v137_v17, %v154_v53 }
 0x162   :  { %v176_v61 = vsub.f32 %v138_v21, %v154_v53  ;;  %v177_v62 = vsub.f32 %v139_v22, %v154_v53 }
 0x163   :  { %v174_v57 = vsub.f32 %v172_v55, %v173_v56 }
 0x165   :  { %v179_v58 = vadd.f32 1e-05, %v174_v57 }
 0x167   :  { %362 = vrsqrt.f32 %v179_v58 }
 0x171   :  { %v363_v63 = vpop.eup %362 }
 0x172   :  { %v184_v0 = vmul.f32 %v363_v63, %v178_v59  ;;  %v181_v1 = vmul.f32 %v363_v63, %v175_v60  ;;  %v182_v2 = vmul.f32 %v363_v63, %v176_v61  ;;  %v183_v3 = vmul.f32 %v363_v63, %v177_v62 }
 0x174   :  { %v185_v4 = vmax.f32 %v181_v1, 0.0  ;;  %v186_v5 = vmax.f32 %v182_v2, 0.0  ;;  %v187_v6 = vmax.f32 %v183_v3, 0.0  ;;  %v188_v7 = vmax.f32 %v184_v0, 0.0 }
 0x176   :  { %v189_v8 = vsel %vm116_vm3, %v185_v4, 0.0  ;;  %v190_v9 = vsel %vm116_vm3, %v186_v5, 0.0  ;;  %v198_v10 = vsel %vm116_vm3, %v187_v6, 0.0  ;;  %v199_v11 = vsel %vm116_vm3, %v188_v7, 0.0 }
 0x177   :  { %v191_v12 = vadd.f32 %v190_v9, %v189_v8  ;;  %v200_v13 = vadd.f32 %v199_v11, %v198_v10 }
 0x179   :  { %v192_v14 = vrot.slane %v191_v12, 4  ;;  %v201_v15 = vrot.slane %v200_v13, 4 }
 0x17b   :  { %v193_v16 = vadd.f32 %v192_v14, %v191_v12  ;;  %v202_v17 = vadd.f32 %v201_v15, %v200_v13 }
 0x17d   :  { %v194_v18 = vrot.slane %v193_v16, 2  ;;  %v203_v19 = vrot.slane %v202_v17, 2 }
 0x17f   :  { %v195_v20 = vadd.f32 %v194_v18, %v193_v16  ;;  %v204_v21 = vadd.f32 %v203_v19, %v202_v17 }
 0x181   :  { %v196_v22 = vrot.slane %v195_v20, 1  ;;  %v205_v23 = vrot.slane %v204_v21, 1 }
 0x183   :  { %v197_v24 = vadd.f32 %v196_v22, %v195_v20  ;;  %v206_v25 = vadd.f32 %v205_v23, %v204_v21 }
 0x185   :  { %v208_v26 = vmul.f32 0.0625, %v197_v24  ;;  %v209_v27 = vmul.f32 0.0625, %v206_v25 }
 0x187   :  { %v217_v28 = vsel %vm216_vm8, %v209_v27, %v208_v26 }
 0x188   :  { %332 = vmatmul.mubr.msk.f32.vlgmr.msra.gmra.mrb[0].mxu0 %vm116_vm3, %v217_v28 }
 0x25b   :  { %v290_v30 = vpop.f32.mrb[0].mxu0 }
 0x25c   :  { %v291_v31 = vadd.f32 %v315_v29, %v290_v30  ;;  %v333_v32 = vpop.f32.mrb[1].mxu0 }
 0x25e   :  { %v294_v33 = vmax.f32 %v291_v31, 0.0 }
 0x260   :  { %296 = vst.msk [vmem:[#allocation2] sm:$0x3] %vm295_vm9, %v294_v33 }
 0x261   :  { %375 = shalt.err (!%p372_p4)
}
 0x262   :  { %s376_s2 = scalar_lea.hbm %s492_s3, 32 }
 0x263   :  { %p377_p5 = scmp.ne.s32.totalorder %s492_s3, %s376_s2  ;;  %p380_p6 = scmp.lt.u32.totalorder %s376_s2, %s492_s3 }
 0x265   :  { %p382_p7 = pnand %p380_p6, %p377_p5 }
 0x267   :  { %385 = shalt.err (!%p382_p7)
}
 0x268   :  { %306 = dma.vmem_to_hbm [thread:$0]  %s304_s10, 32, %s492_s3, [#allocation3]  }
 0x269   :  { %386 = dma.done.wait [#allocation3], 32  }
 0x26a   :  { %387 = vsyncadd [#allocation3], 4294967264 }
 0x26b   :  { %310 = vsyncpa [#allocation3], 1 }

</bundles_post_ra>
